<compile_context>
chip_gen: v7x
topology: tpu7x:2x2x1
jax: 0.10.0
libtpu: 0.0.40
codegen_flags: <defaults>
</compile_context>

<pallas_src>
import functools

import jax
import jax.numpy as jnp
from jax.experimental import pallas as pl
from jax.experimental.pallas import tpu as pltpu


# ----------------------------- Pallas kernel --------------------------------
def inverted_residual_kernel(*refs, H, W, use_res, expand, mxu_dtype):
    if expand:
        (x_ref, rc_ref, w1_ref, b1_ref,
         wdw_ref, b2_ref, w3_ref, b3_ref, o_ref) = refs
    else:
        (x_ref, rc_ref,
         wdw_ref, b2_ref, w3_ref, b3_ref, o_ref) = refs

    hw = H * W
    x = x_ref[0]                                # (Cin, HW), f32, lanes = HW

    # --- 1x1 expansion conv (BN scale pre-folded into w1) + bias + ReLU6 ----
    if expand:
        h = jnp.dot(w1_ref[...], x.astype(mxu_dtype),
                    preferred_element_type=jnp.float32)        # (hidden, HW)
        h = jnp.clip(h + b1_ref[...], 0.0, 6.0)
    else:
        h = x

    # --- 3x3 depthwise conv (stride 1, pad 1), BN folded, + bias + ReLU6 ----
    # 9 taps: lane-roll of the flat (C, H*W) activation + edge masks.
    row = rc_ref[0:1, :]                        # (1, HW) int32, precomputed
    col = rc_ref[1:2, :]                        # (1, HW) int32, precomputed
    wdw = wdw_ref[...]                          # (hidden, 9), scale folded

    acc = h * wdw[:, 4:5]                       # centre tap (dy=0,dx=0), no mask
    for dy in (-1, 0, 1):
        for dx in (-1, 0, 1):
            if dy == 0 and dx == 0:
                continue
            t = (dy + 1) * 3 + (dx + 1)
            shift = (-(dy * W + dx)) % hw       # out[p] <- h[p + dy*W + dx]
            shifted = pltpu.roll(h, shift, axis=1)
            conds = []
            if dy == -1:
                conds.append(row >= 1)
            elif dy == 1:
                conds.append(row <= H - 2)
            if dx == -1:
                conds.append(col >= 1)
            elif dx == 1:
                conds.append(col <= W - 2)
            ok = conds[0]
            for c in conds[1:]:
                ok = jnp.logical_and(ok, c)
            acc = acc + jnp.where(ok, shifted, 0.0) * wdw[:, t:t + 1]

    d = jnp.clip(acc + b2_ref[...], 0.0, 6.0)   # (hidden, HW), f32

    # --- 1x1 projection conv (BN scale pre-folded) + bias (no activation) ---
    out = jnp.dot(w3_ref[...], d.astype(mxu_dtype),
                  preferred_element_type=jnp.float32)          # (oup, HW)
    out = out + b3_ref[...]

    if use_res:
        out = out + x

    o_ref[0] = out.astype(o_ref.dtype)


# ------------------------------- wrapper -------------------------------------
def inverted_residual(x_nchw, params, *, stride, expand_ratio, oup,
                      mxu_dtype=jnp.bfloat16):
    # TODO(synk): stride=2 path not implemented; demo config uses stride=1.
    assert stride == 1, "only stride=1 supported in this kernel"

    N, cin, H, W = x_nchw.shape
    hw = H * W
    hidden = int(round(cin * expand_ratio))
    use_res = (stride == 1 and cin == oup)
    expand = (expand_ratio != 1)
    f32 = jnp.float32

    # NCHW -> (N, C, H*W): free reshape, keeps H*W dense on the lane axis.
    x = x_nchw.reshape(N, cin, hw).astype(f32)

    # Fold BN scales into the conv weights (numerically identical; removes
    # three full-tensor VPU multiplies from the kernel). Biases stay separate.
    if expand:
        w1e = (params["w1"].astype(f32) * params["s1"][None, :]).T          # (hidden, cin)
        w1e = w1e.astype(mxu_dtype)
        b1e = params["b1"].reshape(hidden, 1).astype(f32)
    wdwe = (params["wdw"].astype(f32) * params["s2"][None, None, :])
    wdwe = wdwe.reshape(9, hidden).T.astype(f32)                            # (hidden, 9)
    b2e = params["b2"].reshape(hidden, 1).astype(f32)
    w3e = (params["w3"].astype(f32) * params["s3"][None, :]).T.astype(mxu_dtype)  # (oup, hidden)
    b3e = params["b3"].reshape(oup, 1).astype(f32)

    # Precomputed row/col indices for the depthwise edge masks (keeps integer
    # div/mod out of the kernel body).
    pos = jnp.arange(hw, dtype=jnp.int32)
    rc = jnp.stack([pos // W, pos % W], axis=0)                             # (2, HW)

    kernel = functools.partial(inverted_residual_kernel, H=H, W=W,
                               use_res=use_res, expand=expand,
                               mxu_dtype=mxu_dtype)

    def full_spec(shape):
        return pl.BlockSpec(shape, lambda n, s=shape: (0,) * len(s))

    in_specs = [pl.BlockSpec((1, cin, hw), lambda n: (n, 0, 0)),
                full_spec((2, hw))]
    args = [x, rc]
    if expand:
        in_specs += [full_spec((hidden, cin)), full_spec((hidden, 1))]
        args += [w1e, b1e]
    in_specs += [full_spec((hidden, 9)), full_spec((hidden, 1)),
                 full_spec((oup, hidden)), full_spec((oup, 1))]
    args += [wdwe, b2e, w3e, b3e]

    out = pl.pallas_call(
        kernel,
        grid=(N,),
        in_specs=in_specs,
        out_specs=pl.BlockSpec((1, oup, hw), lambda n: (n, 0, 0)),
        out_shape=jax.ShapeDtypeStruct((N, oup, hw), jnp.float32),
        compiler_params=pltpu.CompilerParams(
            dimension_semantics=("parallel",),
            vmem_limit_bytes=32 * 1024 * 1024),
    )(*args)

    return out.reshape(N, oup, H, W)            # NCHW out, no transpose needed


# --------------------------- parameter synthesis ------------------------------
def _fold_bn(gamma, beta, mean, var, eps=1e-5):
    scale = gamma / jnp.sqrt(var + eps)
    shift = beta - mean * scale
    return scale, shift


def init_params(key, inp, oup, expand_ratio):
    hidden = int(round(inp * expand_ratio))
    ks = jax.random.split(key, 16)
    p = {}

    def bn(i, c):
        g = 1.0 + 0.1 * jax.random.normal(ks[i], (c,), jnp.float32)
        b = 0.1 * jax.random.normal(ks[i + 1], (c,), jnp.float32)
        m = 0.1 * jax.random.normal(ks[i + 2], (c,), jnp.float32)
        v = 1.0 + 0.5 * jax.random.uniform(ks[i + 3], (c,), jnp.float32)
        return _fold_bn(g, b, m, v)

    if expand_ratio != 1:
        p["w1"] = 0.2 * jax.random.normal(ks[0], (inp, hidden), jnp.float32)
        p["s1"], p["b1"] = bn(1, hidden)
    p["wdw"] = 0.2 * jax.random.normal(ks[5], (3, 3, hidden), jnp.float32)
    p["s2"], p["b2"] = bn(6, hidden)
    p["w3"] = 0.2 * jax.random.normal(ks[10], (hidden, oup), jnp.float32)
    p["s3"], p["b3"] = bn(11, oup)
    return p


# ---------------------------- pure-JAX reference ------------------------------
def ref_forward(x_nchw, p, *, stride, expand_ratio, oup):
    x = jnp.transpose(x_nchw, (0, 2, 3, 1)).astype(jnp.float32)  # NHWC
    cin = x.shape[-1]
    hidden = p["wdw"].shape[-1]
    use_res = (stride == 1 and cin == oup)
    dn = ("NHWC", "HWIO", "NHWC")

    h = x
    if expand_ratio != 1:
        h = jax.lax.conv_general_dilated(h, p["w1"][None, None], (1, 1), "VALID",
                                         dimension_numbers=dn)
        h = jnp.clip(h * p["s1"] + p["b1"], 0.0, 6.0)
    h = jax.lax.conv_general_dilated(h, p["wdw"][:, :, None, :],
                                     (stride, stride), ((1, 1), (1, 1)),
                                     dimension_numbers=dn,
                                     feature_group_count=hidden)
    h = jnp.clip(h * p["s2"] + p["b2"], 0.0, 6.0)
    h = jax.lax.conv_general_dilated(h, p["w3"][None, None], (1, 1), "VALID",
                                     dimension_numbers=dn)
    h = h * p["s3"] + p["b3"]
    out = x + h if use_res else h
    return jnp.transpose(out, (0, 3, 1, 2))


# ----------------------------------- main -------------------------------------
if __name__ == "__main__":
    inp, oup, stride, expand_ratio = 4, 4, 1, 6   # hidden_dim = 24, residual used
    N, H, W = 2, 16, 16

    key = jax.random.PRNGKey(0)
    kx, kp = jax.random.split(key)
    x = jax.random.normal(kx, (N, inp, H, W), jnp.float32)
    params = init_params(kp, inp, oup, expand_ratio)

    y_ref = ref_forward(x, params, stride=stride,
                        expand_ratio=expand_ratio, oup=oup)

    # Strict check: f32-MXU mode must match the f32 reference tightly.
    y_f32 = inverted_residual(x, params, stride=stride,
                              expand_ratio=expand_ratio, oup=oup,
                              mxu_dtype=jnp.float32)
    jax.block_until_ready(y_f32)
    err32 = float(jnp.max(jnp.abs(y_f32 - y_ref)))
    assert err32 < 1e-4, f"f32 kernel mismatch vs reference: max abs err {err32}"

    # Production mode: bf16 MXU operands (f32 accumulation); loose check vs the
    # f32 reference (tolerance reflects bf16 operand rounding in the 1x1 convs).
    y_bf16 = inverted_residual(x, params, stride=stride,
                               expand_ratio=expand_ratio, oup=oup,
                               mxu_dtype=jnp.bfloat16)
    jax.block_until_ready(y_bf16)
    errbf = float(jnp.max(jnp.abs(y_bf16 - y_ref)))
    assert errbf < 1e-1, f"bf16 kernel mismatch vs reference: max abs err {errbf}"

    print("KERNEL_OK")
</pallas_src>

<mosaic_0001>
module attributes {stable_mosaic.version = 11 : i64} {
  func.func @inverted_residual_kernel(%arg0: i32, %arg1: memref<1x4x256xf32, #tpu.memory_space<vmem>>, %arg2: memref<2x256xi32, #tpu.memory_space<vmem>>, %arg3: memref<24x4xf32, #tpu.memory_space<vmem>>, %arg4: memref<24x1xf32, #tpu.memory_space<vmem>>, %arg5: memref<24x9xf32, #tpu.memory_space<vmem>>, %arg6: memref<24x1xf32, #tpu.memory_space<vmem>>, %arg7: memref<4x24xf32, #tpu.memory_space<vmem>>, %arg8: memref<4x1xf32, #tpu.memory_space<vmem>>, %arg9: memref<1x4x256xf32, #tpu.memory_space<vmem>>) attributes {dimension_semantics = [#tpu.dimension_semantics<parallel>], iteration_bounds = array<i64: 2>, scalar_prefetch = 0 : i64, scratch_operands = 0 : i64, tpu.core_type = #tpu.core_type<tc>, window_params = [{transform_indices = @transform_0, window_bounds = array<i64: 1, 4, 256>}, {pipeline_mode = #tpu.pipeline_mode<synchronous>, transform_indices = @transform_1, window_bounds = array<i64: 2, 256>}, {pipeline_mode = #tpu.pipeline_mode<synchronous>, transform_indices = @transform_2, window_bounds = array<i64: 24, 4>}, {pipeline_mode = #tpu.pipeline_mode<synchronous>, transform_indices = @transform_3, window_bounds = array<i64: 24, 1>}, {pipeline_mode = #tpu.pipeline_mode<synchronous>, transform_indices = @transform_4, window_bounds = array<i64: 24, 9>}, {pipeline_mode = #tpu.pipeline_mode<synchronous>, transform_indices = @transform_5, window_bounds = array<i64: 24, 1>}, {pipeline_mode = #tpu.pipeline_mode<synchronous>, transform_indices = @transform_6, window_bounds = array<i64: 4, 24>}, {pipeline_mode = #tpu.pipeline_mode<synchronous>, transform_indices = @transform_7, window_bounds = array<i64: 4, 1>}, {transform_indices = @transform_8, window_bounds = array<i64: 1, 4, 256>}]} {
    %c0 = arith.constant 0 : index
    %c0_0 = arith.constant 0 : index
    %c0_1 = arith.constant 0 : index
    %0 = vector.load %arg1[%c0, %c0_0, %c0_1] : memref<1x4x256xf32, #tpu.memory_space<vmem>>, vector<1x4x256xf32>
    %1 = vector.shape_cast %0 : vector<1x4x256xf32> to vector<4x256xf32>
    %c0_2 = arith.constant 0 : index
    %c0_3 = arith.constant 0 : index
    %2 = vector.load %arg3[%c0_2, %c0_3] : memref<24x4xf32, #tpu.memory_space<vmem>>, vector<24x4xf32>
    %cst = arith.constant dense<0.000000e+00> : vector<24x256xf32>
    %3 = tpu.matmul %2, %1, %cst {dimension_numbers = #tpu.dot_dimension_numbers<[1], [0], [0], [1], [0, 0, 1, 1], [], []>} : vector<24x4xf32>, vector<4x256xf32>, vector<24x256xf32> -> vector<24x256xf32>
    %c0_4 = arith.constant 0 : index
    %c0_5 = arith.constant 0 : index
    %4 = vector.load %arg4[%c0_4, %c0_5] : memref<24x1xf32, #tpu.memory_space<vmem>>, vector<24x1xf32>
    %5 = vector.broadcast %4 : vector<24x1xf32> to vector<24x256xf32>
    %6 = arith.addf %3, %5 : vector<24x256xf32>
    %cst_6 = arith.constant 0.000000e+00 : f32
    %cst_7 = arith.constant 6.000000e+00 : f32
    %7 = vector.broadcast %cst_6 : f32 to vector<24x256xf32>
    %8 = arith.maximumf %7, %6 : vector<24x256xf32>
    %9 = vector.broadcast %cst_7 : f32 to vector<24x256xf32>
    %10 = arith.minimumf %9, %8 : vector<24x256xf32>
    %c0_8 = arith.constant 0 : index
    %c0_9 = arith.constant 0 : index
    %11 = vector.load %arg2[%c0_8, %c0_9] : memref<2x256xi32, #tpu.memory_space<vmem>>, vector<1x256xi32>
    %c1 = arith.constant 1 : index
    %c0_10 = arith.constant 0 : index
    %12 = vector.load %arg2[%c1, %c0_10] : memref<2x256xi32, #tpu.memory_space<vmem>>, vector<1x256xi32>
    %c0_11 = arith.constant 0 : index
    %c0_12 = arith.constant 0 : index
    %13 = vector.load %arg5[%c0_11, %c0_12] : memref<24x9xf32, #tpu.memory_space<vmem>>, vector<24x9xf32>
    %14 = vector.extract_strided_slice %13 {offsets = [0, 4], sizes = [24, 1], strides = [1, 1]} : vector<24x9xf32> to vector<24x1xf32>
    %15 = vector.broadcast %14 : vector<24x1xf32> to vector<24x256xf32>
    %16 = arith.mulf %10, %15 : vector<24x256xf32>
    %c17_i32 = arith.constant 17 : i32
    %17 = tpu.dynamic_rotate %10 by %c17_i32 dim 1 : vector<24x256xf32>, i32 -> vector<24x256xf32>
    %c1_i32 = arith.constant 1 : i32
    %18 = vector.broadcast %c1_i32 : i32 to vector<1x256xi32>
    %19 = arith.cmpi sge, %11, %18 : vector<1x256xi32>
    %c1_i32_13 = arith.constant 1 : i32
    %20 = vector.broadcast %c1_i32_13 : i32 to vector<1x256xi32>
    %21 = arith.cmpi sge, %12, %20 : vector<1x256xi32>
    %22 = arith.andi %19, %21 : vector<1x256xi1>
    %cst_14 = arith.constant 0.000000e+00 : f32
    %23 = vector.shape_cast %22 : vector<1x256xi1> to vector<1x256xi1>
    %24 = vector.broadcast %23 : vector<1x256xi1> to vector<24x256xi1>
    %25 = vector.broadcast %cst_14 : f32 to vector<24x256xf32>
    %26 = arith.select %24, %17, %25 : vector<24x256xi1>, vector<24x256xf32>
    %27 = vector.extract_strided_slice %13 {offsets = [0, 0], sizes = [24, 1], strides = [1, 1]} : vector<24x9xf32> to vector<24x1xf32>
    %28 = vector.broadcast %27 : vector<24x1xf32> to vector<24x256xf32>
    %29 = arith.mulf %26, %28 : vector<24x256xf32>
    %30 = arith.addf %16, %29 : vector<24x256xf32>
    %c16_i32 = arith.constant 16 : i32
    %31 = tpu.dynamic_rotate %10 by %c16_i32 dim 1 : vector<24x256xf32>, i32 -> vector<24x256xf32>
    %c1_i32_15 = arith.constant 1 : i32
    %32 = vector.broadcast %c1_i32_15 : i32 to vector<1x256xi32>
    %33 = arith.cmpi sge, %11, %32 : vector<1x256xi32>
    %cst_16 = arith.constant 0.000000e+00 : f32
    %34 = vector.shape_cast %33 : vector<1x256xi1> to vector<1x256xi1>
    %35 = vector.broadcast %34 : vector<1x256xi1> to vector<24x256xi1>
    %36 = vector.broadcast %cst_16 : f32 to vector<24x256xf32>
    %37 = arith.select %35, %31, %36 : vector<24x256xi1>, vector<24x256xf32>
    %38 = vector.extract_strided_slice %13 {offsets = [0, 1], sizes = [24, 1], strides = [1, 1]} : vector<24x9xf32> to vector<24x1xf32>
    %39 = vector.broadcast %38 : vector<24x1xf32> to vector<24x256xf32>
    %40 = arith.mulf %37, %39 : vector<24x256xf32>
    %41 = arith.addf %30, %40 : vector<24x256xf32>
    %c15_i32 = arith.constant 15 : i32
    %42 = tpu.dynamic_rotate %10 by %c15_i32 dim 1 : vector<24x256xf32>, i32 -> vector<24x256xf32>
    %c1_i32_17 = arith.constant 1 : i32
    %43 = vector.broadcast %c1_i32_17 : i32 to vector<1x256xi32>
    %44 = arith.cmpi sge, %11, %43 : vector<1x256xi32>
    %c14_i32 = arith.constant 14 : i32
    %45 = vector.broadcast %c14_i32 : i32 to vector<1x256xi32>
    %46 = arith.cmpi sle, %12, %45 : vector<1x256xi32>
    %47 = arith.andi %44, %46 : vector<1x256xi1>
    %cst_18 = arith.constant 0.000000e+00 : f32
    %48 = vector.shape_cast %47 : vector<1x256xi1> to vector<1x256xi1>
    %49 = vector.broadcast %48 : vector<1x256xi1> to vector<24x256xi1>
    %50 = vector.broadcast %cst_18 : f32 to vector<24x256xf32>
    %51 = arith.select %49, %42, %50 : vector<24x256xi1>, vector<24x256xf32>
    %52 = vector.extract_strided_slice %13 {offsets = [0, 2], sizes = [24, 1], strides = [1, 1]} : vector<24x9xf32> to vector<24x1xf32>
    %53 = vector.broadcast %52 : vector<24x1xf32> to vector<24x256xf32>
    %54 = arith.mulf %51, %53 : vector<24x256xf32>
    %55 = arith.addf %41, %54 : vector<24x256xf32>
    %c1_i32_19 = arith.constant 1 : i32
    %56 = tpu.dynamic_rotate %10 by %c1_i32_19 dim 1 : vector<24x256xf32>, i32 -> vector<24x256xf32>
    %c1_i32_20 = arith.constant 1 : i32
    %57 = vector.broadcast %c1_i32_20 : i32 to vector<1x256xi32>
    %58 = arith.cmpi sge, %12, %57 : vector<1x256xi32>
    %cst_21 = arith.constant 0.000000e+00 : f32
    %59 = vector.shape_cast %58 : vector<1x256xi1> to vector<1x256xi1>
    %60 = vector.broadcast %59 : vector<1x256xi1> to vector<24x256xi1>
    %61 = vector.broadcast %cst_21 : f32 to vector<24x256xf32>
    %62 = arith.select %60, %56, %61 : vector<24x256xi1>, vector<24x256xf32>
    %63 = vector.extract_strided_slice %13 {offsets = [0, 3], sizes = [24, 1], strides = [1, 1]} : vector<24x9xf32> to vector<24x1xf32>
    %64 = vector.broadcast %63 : vector<24x1xf32> to vector<24x256xf32>
    %65 = arith.mulf %62, %64 : vector<24x256xf32>
    %66 = arith.addf %55, %65 : vector<24x256xf32>
    %c255_i32 = arith.constant 255 : i32
    %67 = tpu.dynamic_rotate %10 by %c255_i32 dim 1 : vector<24x256xf32>, i32 -> vector<24x256xf32>
    %c14_i32_22 = arith.constant 14 : i32
    %68 = vector.broadcast %c14_i32_22 : i32 to vector<1x256xi32>
    %69 = arith.cmpi sle, %12, %68 : vector<1x256xi32>
    %cst_23 = arith.constant 0.000000e+00 : f32
    %70 = vector.shape_cast %69 : vector<1x256xi1> to vector<1x256xi1>
    %71 = vector.broadcast %70 : vector<1x256xi1> to vector<24x256xi1>
    %72 = vector.broadcast %cst_23 : f32 to vector<24x256xf32>
    %73 = arith.select %71, %67, %72 : vector<24x256xi1>, vector<24x256xf32>
    %74 = vector.extract_strided_slice %13 {offsets = [0, 5], sizes = [24, 1], strides = [1, 1]} : vector<24x9xf32> to vector<24x1xf32>
    %75 = vector.broadcast %74 : vector<24x1xf32> to vector<24x256xf32>
    %76 = arith.mulf %73, %75 : vector<24x256xf32>
    %77 = arith.addf %66, %76 : vector<24x256xf32>
    %c241_i32 = arith.constant 241 : i32
    %78 = tpu.dynamic_rotate %10 by %c241_i32 dim 1 : vector<24x256xf32>, i32 -> vector<24x256xf32>
    %c14_i32_24 = arith.constant 14 : i32
    %79 = vector.broadcast %c14_i32_24 : i32 to vector<1x256xi32>
    %80 = arith.cmpi sle, %11, %79 : vector<1x256xi32>
    %c1_i32_25 = arith.constant 1 : i32
    %81 = vector.broadcast %c1_i32_25 : i32 to vector<1x256xi32>
    %82 = arith.cmpi sge, %12, %81 : vector<1x256xi32>
    %83 = arith.andi %80, %82 : vector<1x256xi1>
    %cst_26 = arith.constant 0.000000e+00 : f32
    %84 = vector.shape_cast %83 : vector<1x256xi1> to vector<1x256xi1>
    %85 = vector.broadcast %84 : vector<1x256xi1> to vector<24x256xi1>
    %86 = vector.broadcast %cst_26 : f32 to vector<24x256xf32>
    %87 = arith.select %85, %78, %86 : vector<24x256xi1>, vector<24x256xf32>
    %88 = vector.extract_strided_slice %13 {offsets = [0, 6], sizes = [24, 1], strides = [1, 1]} : vector<24x9xf32> to vector<24x1xf32>
    %89 = vector.broadcast %88 : vector<24x1xf32> to vector<24x256xf32>
    %90 = arith.mulf %87, %89 : vector<24x256xf32>
    %91 = arith.addf %77, %90 : vector<24x256xf32>
    %c240_i32 = arith.constant 240 : i32
    %92 = tpu.dynamic_rotate %10 by %c240_i32 dim 1 : vector<24x256xf32>, i32 -> vector<24x256xf32>
    %c14_i32_27 = arith.constant 14 : i32
    %93 = vector.broadcast %c14_i32_27 : i32 to vector<1x256xi32>
    %94 = arith.cmpi sle, %11, %93 : vector<1x256xi32>
    %cst_28 = arith.constant 0.000000e+00 : f32
    %95 = vector.shape_cast %94 : vector<1x256xi1> to vector<1x256xi1>
    %96 = vector.broadcast %95 : vector<1x256xi1> to vector<24x256xi1>
    %97 = vector.broadcast %cst_28 : f32 to vector<24x256xf32>
    %98 = arith.select %96, %92, %97 : vector<24x256xi1>, vector<24x256xf32>
    %99 = vector.extract_strided_slice %13 {offsets = [0, 7], sizes = [24, 1], strides = [1, 1]} : vector<24x9xf32> to vector<24x1xf32>
    %100 = vector.broadcast %99 : vector<24x1xf32> to vector<24x256xf32>
    %101 = arith.mulf %98, %100 : vector<24x256xf32>
    %102 = arith.addf %91, %101 : vector<24x256xf32>
    %c239_i32 = arith.constant 239 : i32
    %103 = tpu.dynamic_rotate %10 by %c239_i32 dim 1 : vector<24x256xf32>, i32 -> vector<24x256xf32>
    %c14_i32_29 = arith.constant 14 : i32
    %104 = vector.broadcast %c14_i32_29 : i32 to vector<1x256xi32>
    %105 = arith.cmpi sle, %11, %104 : vector<1x256xi32>
    %c14_i32_30 = arith.constant 14 : i32
    %106 = vector.broadcast %c14_i32_30 : i32 to vector<1x256xi32>
    %107 = arith.cmpi sle, %12, %106 : vector<1x256xi32>
    %108 = arith.andi %105, %107 : vector<1x256xi1>
    %cst_31 = arith.constant 0.000000e+00 : f32
    %109 = vector.shape_cast %108 : vector<1x256xi1> to vector<1x256xi1>
    %110 = vector.broadcast %109 : vector<1x256xi1> to vector<24x256xi1>
    %111 = vector.broadcast %cst_31 : f32 to vector<24x256xf32>
    %112 = arith.select %110, %103, %111 : vector<24x256xi1>, vector<24x256xf32>
    %113 = vector.extract_strided_slice %13 {offsets = [0, 8], sizes = [24, 1], strides = [1, 1]} : vector<24x9xf32> to vector<24x1xf32>
    %114 = vector.broadcast %113 : vector<24x1xf32> to vector<24x256xf32>
    %115 = arith.mulf %112, %114 : vector<24x256xf32>
    %116 = arith.addf %102, %115 : vector<24x256xf32>
    %c0_32 = arith.constant 0 : index
    %c0_33 = arith.constant 0 : index
    %117 = vector.load %arg6[%c0_32, %c0_33] : memref<24x1xf32, #tpu.memory_space<vmem>>, vector<24x1xf32>
    %118 = vector.broadcast %117 : vector<24x1xf32> to vector<24x256xf32>
    %119 = arith.addf %116, %118 : vector<24x256xf32>
    %cst_34 = arith.constant 0.000000e+00 : f32
    %cst_35 = arith.constant 6.000000e+00 : f32
    %120 = vector.broadcast %cst_34 : f32 to vector<24x256xf32>
    %121 = arith.maximumf %120, %119 : vector<24x256xf32>
    %122 = vector.broadcast %cst_35 : f32 to vector<24x256xf32>
    %123 = arith.minimumf %122, %121 : vector<24x256xf32>
    %c0_36 = arith.constant 0 : index
    %c0_37 = arith.constant 0 : index
    %124 = vector.load %arg7[%c0_36, %c0_37] : memref<4x24xf32, #tpu.memory_space<vmem>>, vector<4x24xf32>
    %cst_38 = arith.constant dense<0.000000e+00> : vector<4x256xf32>
    %125 = tpu.matmul %124, %123, %cst_38 {dimension_numbers = #tpu.dot_dimension_numbers<[1], [0], [0], [1], [0, 0, 1, 1], [], []>} : vector<4x24xf32>, vector<24x256xf32>, vector<4x256xf32> -> vector<4x256xf32>
    %c0_39 = arith.constant 0 : index
    %c0_40 = arith.constant 0 : index
    %126 = vector.load %arg8[%c0_39, %c0_40] : memref<4x1xf32, #tpu.memory_space<vmem>>, vector<4x1xf32>
    %127 = vector.broadcast %126 : vector<4x1xf32> to vector<4x256xf32>
    %128 = arith.addf %125, %127 : vector<4x256xf32>
    %129 = arith.addf %128, %1 : vector<4x256xf32>
    %c0_41 = arith.constant 0 : index
    %c0_42 = arith.constant 0 : index
    %c0_43 = arith.constant 0 : index
    %130 = vector.load %arg9[%c0_41, %c0_42, %c0_43] : memref<1x4x256xf32, #tpu.memory_space<vmem>>, vector<1x4x256xf32>
    %131 = vector.shape_cast %130 : vector<1x4x256xf32> to vector<4x256xf32>
    %132 = vector.shape_cast %129 : vector<4x256xf32> to vector<1x4x256xf32>
    tpu.vector_store %arg9[%c0_41, %c0_42, %c0_43], %132 {strides = array<i32>} : memref<1x4x256xf32, #tpu.memory_space<vmem>>, vector<1x4x256xf32>,
    return
  }
  func.func @transform_0(%arg0: i32) -> (i32, i32, i32) {
    %c0_i32 = arith.constant 0 : i32
    %c0_i32_0 = arith.constant 0 : i32
    %c0_i32_1 = arith.constant 0 : i32
    return %arg0, %c0_i32, %c0_i32_0 : i32, i32, i32
  }
  func.func @transform_1(%arg0: i32) -> (i32, i32) {
    %c0_i32 = arith.constant 0 : i32
    %c0_i32_0 = arith.constant 0 : i32
    %c0_i32_1 = arith.constant 0 : i32
    return %c0_i32, %c0_i32_0 : i32, i32
  }
  func.func @transform_2(%arg0: i32) -> (i32, i32) {
    %c0_i32 = arith.constant 0 : i32
    %c0_i32_0 = arith.constant 0 : i32
    %c0_i32_1 = arith.constant 0 : i32
    return %c0_i32, %c0_i32_0 : i32, i32
  }
  func.func @transform_3(%arg0: i32) -> (i32, i32) {
    %c0_i32 = arith.constant 0 : i32
    %c0_i32_0 = arith.constant 0 : i32
    %c0_i32_1 = arith.constant 0 : i32
    return %c0_i32, %c0_i32_0 : i32, i32
  }
  func.func @transform_4(%arg0: i32) -> (i32, i32) {
    %c0_i32 = arith.constant 0 : i32
    %c0_i32_0 = arith.constant 0 : i32
    %c0_i32_1 = arith.constant 0 : i32
    return %c0_i32, %c0_i32_0 : i32, i32
  }
  func.func @transform_5(%arg0: i32) -> (i32, i32) {
    %c0_i32 = arith.constant 0 : i32
    %c0_i32_0 = arith.constant 0 : i32
    %c0_i32_1 = arith.constant 0 : i32
    return %c0_i32, %c0_i32_0 : i32, i32
  }
  func.func @transform_6(%arg0: i32) -> (i32, i32) {
    %c0_i32 = arith.constant 0 : i32
    %c0_i32_0 = arith.constant 0 : i32
    %c0_i32_1 = arith.constant 0 : i32
    return %c0_i32, %c0_i32_0 : i32, i32
  }
  func.func @transform_7(%arg0: i32) -> (i32, i32) {
    %c0_i32 = arith.constant 0 : i32
    %c0_i32_0 = arith.constant 0 : i32
    %c0_i32_1 = arith.constant 0 : i32
    return %c0_i32, %c0_i32_0 : i32, i32
  }
  func.func @transform_8(%arg0: i32) -> (i32, i32, i32) {
    %c0_i32 = arith.constant 0 : i32
    %c0_i32_0 = arith.constant 0 : i32
    %c0_i32_1 = arith.constant 0 : i32
    return %arg0, %c0_i32, %c0_i32_0 : i32, i32, i32
  }
}

</mosaic_0001>

<bundles_post_ra>
// kernel: tpu_custom_call.1
= control target key start
LH: loop header
LB: loop body
LE: loop exit
PB: predicated region body
PF: predicated region fallthrough
CT: control target
= control target key end

     0   :  { %13 = vsyncpa [#allocation3], 0  ;;  %s2191_s0 = inlined_call_operand.vmem [shape: f32[2,4,256], index: 0, kind: input, shape index: {}]   ;;  %s2192_s1 = inlined_call_operand.vmem [shape: s32[2,256], index: 1, kind: input, shape index: {}]   ;;  %s2193_s2 = inlined_call_operand.vmem [shape: f32[24,4], index: 2, kind: input, shape index: {}]   ;;  %s2194_s3 = inlined_call_operand.vmem [shape: f32[24,1], index: 3, kind: input, shape index: {}]   ;;  %s2195_s4 = inlined_call_operand.vmem [shape: f32[24,9], index: 4, kind: input, shape index: {}]   ;;  %s2196_s5 = inlined_call_operand.vmem [shape: f32[24,1], index: 5, kind: input, shape index: {}]   ;;  %s2197_s6 = inlined_call_operand.vmem [shape: f32[4,24], index: 6, kind: input, shape index: {}]   ;;  %s2198_s7 = inlined_call_operand.vmem [shape: f32[4,1], index: 7, kind: input, shape index: {}]   ;;  %s2199_s8 = inlined_call_operand.hbm [shape: f32[2,4,256], index: 8, kind: output, shape index: {}]  }
   0x1   :  { %15 = vsyncpa [#allocation3 + $0x1], 0  ;;  %s1389_s27 = smov 0   ;;  %s1391_s28 = smov 0  }
   0x2   :  { %s1393_s29 = smov 0   ;;  %s1395_s30 = smov 0  }
   0x3 LB: > { %s1410_s9 = sadd.s32 4294967295, %s1323_s30   ;;  %s1155_s10 = sadd.s32 4294967294, %s1323_s30   ;;  %s1323_s30 = sphi %s1395_s30, %s2353_s30   ;;  %s1319_s29 = sphi %s1393_s29, %s2352_s29   ;;  %s1315_s28 = sphi %s1391_s28, %s2351_s28   ;;  %s1311_s27 = sphi %s1389_s27, %s2350_s27  }
   0x4   : > { %s1414_s11 = sadd.s32 1, %s1323_s30   ;;  %s201_s12 = sadd.s32 1, %s1319_s29 }
   0x5   : > { %s198_s13 = ssub.s32 %s1323_s30, %s1414_s11  ;;  %p211_p0 = scmp.ne.s32.totalorder %s1319_s29, %s1315_s28 }
   0x6   : > { %p199_p1 = scmp.eq.s32.totalorder %s198_s13, 0  ;;  %p212_p2 = scmp.eq.s32.totalorder %s1410_s9, 1 }
   0x7   : > { %p217_p3 = scmp.ne.s32.totalorder %s1315_s28, %s1311_s27  ;;  %p218_p4 = scmp.eq.s32.totalorder %s1155_s10, 1 }
   0x8   : > { %s1425_s14 = scalar_select %p199_p1, %s1319_s29, %s201_s12  }
   0x9   : > { %p1427_p5 = por %p212_p2, %p211_p0  ;;  %p1431_p6 = por %p218_p4, %p217_p3 }
   0xa   : > { %p1158_p7 = scmp.ge.s32.totalorder %s1323_s30, 1  ;;  %p265_p8 = scmp.lt.s32.totalorder %s1323_s30, 3 }
   0xc   : > { %p266_p9 = pnand %p1158_p7, %p265_p8 }
   0xe   : > { %269 = sbr.rel (%p266_p9) target bundleno = 724 (0x2d4), region = 52 }
  0x15   : > { %p299_p10 = scmp.lt.s32.totalorder %s1410_s9, 1  ;;  %v1325_v0 = vmov 0.0   ;;  %v308_v1 = vld [vmem:[%s2194_s3] sm:$0xff]  ;;  %v2204_v2 = vmov 0   ;;  %v310_v3 = vld [vmem:[%s2194_s3 + $0x10] sm:$0xff]  ;;  %v309_v4 = vld [vmem:[%s2194_s3 + $0x8] sm:$0xff] }
  0x16   : > { %407 = vmatprep.mubr.f32.mxu0 %v1325_v0  ;;  %1066 = vmatprep.mubr.f32.mxu1 %v1325_v0  ;;  %v1458_v5 = vld [vmem:[%s2195_s4] sm:$0xff]  ;;  %vm338_vm0 = vcmask 1043456   ;;  %v1327_v8 = vmov 4   ;;  %vm328_vm1 = vcmask 31744   ;;  %v442_v10 = vld [vmem:[%s2195_s4 + $0x8] sm:$0xff]  ;;  %v443_v12 = vld [vmem:[%s2195_s4 + $0x10] sm:$0xff] }
  0x17   : > { %s300_s19 = scalar_select %p299_p10, %s1410_s9, 1  ;;  %1237 = vset.pattern.permute.xlu0 %v2204_v2  ;;  %1238 = vset.pattern.permute.xlu1 %v2204_v2  ;;  %v305_v9 = vld [vmem:[%s2193_s2] sm:$0xff]  ;;  %v306_v11 = vld [vmem:[%s2193_s2 + $0x8] sm:$0xff]  ;;  %v307_v13 = vld [vmem:[%s2193_s2 + $0x10] sm:$0xff]  ;;  %v1328_v14 = vmov 1   ;;  %v1329_v15 = vmov 2  }
  0x18   : > { %313 = vperm.xlu0 %1237, %v308_v1   ;;  %323 = vperm.xlu1 %1238, %v310_v3   ;;  %v1330_v16 = vmov 3   ;;  %v1331_v17 = vmov 5   ;;  %v1332_v18 = vmov 6   ;;  %v1333_v19 = vmov 7   ;;  %v955_v21 = vld [vmem:[%s2196_s5] sm:$0xff]  ;;  %v956_v22 = vld [vmem:[%s2196_s5 + $0x8] sm:$0xff] }
  0x19   : > { %s1174_s22 = sshll.u32 %s300_s19, 3  ;;  %v1334_v20 = vmov 8   ;;  %s1335_s19 = smov 15   ;;  %v957_v63 = vld [vmem:[%s2196_s5 + $0x10] sm:$0xff]  ;;  %v992_v3 = vld [vmem:[%s2198_s7] sm:$0xf] }
  0x1a   : > { %s1453_s10 = scalar_lea.vmem %s2191_s0, %s1174_s22  ;;  %s1336_s20 = smov 17  }
  0x1b   : > { %v304_v6 = vld [vmem:[%s1453_s10] sm:$0xff]  ;;  %s1337_s21 = smov 1   ;;  %s1338_s22 = smov 16  }
  0x1c   : > { %v1461_v7 = vcombine.high %v304_v6, %v304_v6  ;;  %318 = vperm.xlu0 %1237, %v309_v4   ;;  %1239 = vset.pattern.permute.xlu1 %v1327_v8  ;;  %s1339_s23 = smov 127   ;;  %s1340_s24 = smov 113  }
  0x1d   : > { %446 = vperm.xlu1 %1239, %v1458_v5   ;;  %s1341_s25 = smov 112   ;;  %s1342_s26 = smov 111  }
  0x1e   : > { %2235 = vst [vmem:[#allocation5_spill] sm:$0xff] %v1461_v7  ;;  %1162 = vmatprep.subr.msk.mxu0 %vm338_vm0, %v1461_v7  ;;  %s1175_s12 = sshll.u32 %s1410_s9, 7  ;;  %s1343_s9 = smov [#allocation2]  }
  0x1f   : > { %1163 = vmatpush1.msk.msra.mxu0 %vm338_vm0, %v304_v6 }
  0x20   : > { %1164 = vmatmul.mubr.msk.f32.vlgmr.msra.gmra.mrb[0].mxu0 %vm328_vm1, %v305_v9  ;;  %1240 = vset.pattern.permute.xlu0 %v1327_v8 }
  0x21   : > { %413 = vmatprep.mubr.f32.mxu0 %v1325_v0  ;;  %451 = vperm.xlu0 %1240, %v442_v10  }
  0x22   : > { %1241 = vset.pattern.permute.xlu1 %v2204_v2 }
  0x23   : > { %507 = vperm.xlu1 %1241, %v1458_v5  }
  0x24   : > { %1165 = vmatmul.mubr.msk.f32.gmra.mrb[2].mxu0 %vm328_vm1, %v306_v11 }
  0x25   : > { %419 = vmatprep.mubr.f32.mxu0 %v1325_v0  ;;  %456 = vperm.xlu0 %1240, %v443_v12  }
  0x27   : > { %511 = vperm.xlu1 %1241, %v442_v10  }
  0x28   : > { %1166 = vmatmul.mubr.msk.f32.gmra.mrb[4].mxu0 %vm328_vm1, %v307_v13 }
  0x29   : > { %1244 = vset.pattern.permute.xlu0 %v1328_v14 }
  0x2a   : > { %567 = vperm.xlu0 %1244, %v1458_v5  }
  0x2b   : > { %1242 = vset.pattern.permute.xlu1 %v1328_v14 }
  0x2c   : > { %571 = vperm.xlu1 %1242, %v442_v10  }
  0x2e   : > { %575 = vperm.xlu0 %1244, %v443_v12  }
  0x30   : > { %1243 = vset.pattern.permute.xlu1 %v1329_v15 }
  0x31   : > { %629 = vperm.xlu1 %1243, %v1458_v5  }
  0x32   : > { %1247 = vset.pattern.permute.xlu0 %v1329_v15 }
  0x33   : > { %633 = vperm.xlu0 %1247, %v442_v10  }
  0x35   : > { %1245 = vset.pattern.permute.xlu1 %v2204_v2 }
  0x36   : > { %515 = vperm.xlu1 %1245, %v443_v12  }
  0x37   : > { %637 = vperm.xlu0 %1247, %v443_v12  }
  0x3a   : > { %1246 = vset.pattern.permute.xlu1 %v1330_v16 }
  0x3b   : > { %689 = vperm.xlu1 %1246, %v1458_v5   ;;  %1249 = vset.pattern.permute.xlu0 %v1330_v16 }
  0x3c   : > { %693 = vperm.xlu0 %1249, %v442_v10  }
  0x3f   : > { %1248 = vset.pattern.permute.xlu1 %v1331_v17 }
  0x40   : > { %749 = vperm.xlu1 %1248, %v1458_v5   ;;  %697 = vperm.xlu0 %1249, %v443_v12  }
  0x44   : > { %753 = vperm.xlu1 %1248, %v442_v10   ;;  %1252 = vset.pattern.permute.xlu0 %v1331_v17 }
  0x45   : > { %757 = vperm.xlu0 %1252, %v443_v12  }
  0x48   : > { %1250 = vset.pattern.permute.xlu1 %v1332_v18 }
  0x49   : > { %811 = vperm.xlu1 %1250, %v1458_v5   ;;  %1254 = vset.pattern.permute.xlu0 %v1332_v18 }
  0x4a   : > { %819 = vperm.xlu0 %1254, %v443_v12  }
  0x4d   : > { %815 = vperm.xlu1 %1250, %v442_v10  }
  0x4e   : > { %1255 = vset.pattern.permute.xlu0 %v1333_v19 }
  0x4f   : > { %879 = vperm.xlu0 %1255, %v443_v12  }
  0x51   : > { %1251 = vset.pattern.permute.xlu1 %v1333_v19 }
  0x52   : > { %871 = vperm.xlu1 %1251, %v1458_v5  }
  0x53   : > { %1257 = vset.pattern.permute.xlu0 %v1334_v20 }
  0x54   : > { %940 = vperm.xlu0 %1257, %v443_v12  }
  0x56   : > { %875 = vperm.xlu1 %1251, %v442_v10  }
  0x58   : > { %1258 = vset.pattern.permute.xlu0 %v2204_v2 }
  0x5a   : > { %1253 = vset.pattern.permute.xlu1 %v1334_v20 }
  0x5b   : > { %932 = vperm.xlu1 %1253, %v1458_v5  }
  0x5f   : > { %936 = vperm.xlu1 %1253, %v442_v10  }
  0x63   : > { %1256 = vset.pattern.permute.xlu1 %v2204_v2 }
  0x64   : > { %960 = vperm.xlu1 %1256, %v955_v21  }
  0x68   : > { %965 = vperm.xlu1 %1256, %v956_v22  }
  0x97   : > { %v314_v23 = vpop.permute.xlu0 %313  ;;  %v324_v37 = vpop.permute.xlu1 %323 }
  0x9b   : > { %v319_v28 = vpop.permute.xlu0 %318 }
  0x9c   : > { %v1527_v40 = vpop.permute.xlu1 %446 }
  0xa0   : > { %v1571_v50 = vpop.permute.xlu0 %451 }
  0xa2   : > { %v1535_v42 = vpop.permute.xlu1 %507 }
  0xa4   : > { %v1577_v53 = vpop.permute.xlu0 %456 }
  0xa5   : > { %2237 = vst [vmem:[#allocation7_spill] sm:$0xff] %v1577_v53 }
  0xa6   : > { %v1545_v43 = vpop.permute.xlu1 %511 }
  0xa9   : > { %v1587_v56 = vpop.permute.xlu0 %567 }
  0xab   : > { %v1551_v45 = vpop.permute.xlu1 %571 }
  0xad   : > { %v1599_v58 = vpop.permute.xlu0 %575 }
  0xae   : > { %2239 = vst [vmem:[#allocation9_spill] sm:$0xff] %v1599_v58 }
  0xb0   : > { %v1559_v48 = vpop.permute.xlu1 %629 }
  0xb2   : > { %v1607_v60 = vpop.permute.xlu0 %633 }
  0xb5   : > { %v1569_v49 = vpop.permute.xlu1 %515 }
  0xb6   : > { %2236 = vst [vmem:[#allocation6_spill] sm:$0xff] %v1569_v49  ;;  %v1619_v62 = vpop.permute.xlu0 %637 }
  0xb7   : > { %2240 = vst [vmem:[#allocation10_spill] sm:$0xff] %v1619_v62 }
  0xba   : > { %v1579_v54 = vpop.permute.xlu1 %689 }
  0xbb   : > { %v1632_v5 = vpop.permute.xlu0 %693 }
  0xbf   : > { %v1593_v57 = vpop.permute.xlu1 %749  ;;  %v1642_v9 = vpop.permute.xlu0 %697 }
  0xc0   : > { %2242 = vst [vmem:[#allocation12_spill] sm:$0xff] %v1642_v9 }
  0xc3   : > { %v1601_v59 = vpop.permute.xlu1 %753 }
  0xc4   : > { %v1648_v11 = vpop.permute.xlu0 %757 }
  0xc5   : > { %2244 = vst [vmem:[#allocation14_spill] sm:$0xff] %v1648_v11 }
  0xc8   : > { %v1613_v61 = vpop.permute.xlu1 %811 }
  0xc9   : > { %v1656_v13 = vpop.permute.xlu0 %819 }
  0xca   : > { %2245 = vst [vmem:[#allocation15_spill] sm:$0xff] %v1656_v13 }
  0xcc   : > { %v1625_v1 = vpop.permute.xlu1 %815 }
  0xce   : > { %v1662_v15 = vpop.permute.xlu0 %879 }
  0xcf   : > { %2247 = vst [vmem:[#allocation17_spill] sm:$0xff] %v1662_v15 }
  0xd1   : > { %v1636_v6 = vpop.permute.xlu1 %871 }
  0xd3   : > { %v1670_v17 = vpop.permute.xlu0 %940 }
  0xd4   : > { %2249 = vst [vmem:[#allocation19_spill] sm:$0xff] %v1670_v17 }
  0xd5   : > { %v1644_v10 = vpop.permute.xlu1 %875 }
  0xd6   : > { %2243 = vst [vmem:[#allocation13_spill] sm:$0xff] %v1644_v10 }
  0xda   : > { %v1652_v12 = vpop.permute.xlu1 %932 }
  0xde   : > { %v1658_v14 = vpop.permute.xlu1 %936 }
  0xdf   : > { %2246 = vst [vmem:[#allocation16_spill] sm:$0xff] %v1658_v14 }
  0xe3   : > { %v1664_v16 = vpop.permute.xlu1 %960 }
  0xe4   : > { %2248 = vst [vmem:[#allocation18_spill] sm:$0xff] %v1664_v16 }
  0xe7   : > { %v1672_v18 = vpop.permute.xlu1 %965 }
  0xe8   : > { %2250 = vst [vmem:[#allocation20_spill] sm:$0xff] %v1672_v18 }
  0xf3   : > { %v409_v24 = vpop.f32.mrb[0].mxu0 }
  0xf4   : > { %v410_v25 = vadd.f32 %v409_v24, %v314_v23  ;;  %v411_v26 = vpop.f32.mrb[1].mxu0 }
  0xf5   : > { %v412_v38 = vadd.f32 %v411_v26, %v314_v23 }
  0xf6   : > { %v426_v27 = vmax.f32 %v410_v25, 0.0 }
  0xf7   : > { %v415_v29 = vpop.f32.mrb[2].mxu0  ;;  %v427_v39 = vmax.f32 %v412_v38, 0.0 }
  0xf8   : > { %v1501_v30 = vmin.f32 %v426_v27, 6.0  ;;  %v416_v31 = vadd.f32 %v415_v29, %v319_v28  ;;  %v417_v32 = vpop.f32.mrb[3].mxu0  ;;  %v1693_v27 = vld [vmem:[%s2192_s1] ss:$2 sm:$0x3]  ;;  %v477_v29 = vlaneseq }
  0xf9   : > { %v1533_v41 = vmin.f32 %v427_v39, 6.0  ;;  %v418_v44 = vadd.f32 %v417_v32, %v319_v28  ;;  %v1698_v28 = vld [vmem:[%s2192_s1 + $0x1] ss:$2 sm:$0x3]  ;;  %vm486_vm2 = vcmp.ge.s32.totalorder %v1693_v27, 1  ;;  %vm791_vm7 = vcmp.le.s32.totalorder %v1693_v27, 14 }
  0xfa   : > { %590 = vrot.lane.b32.xlu0 %v1501_v30, %s1335_s19  ;;  %465 = vrot.lane.b32.xlu1 %v1501_v30, %s1336_s20  ;;  %v428_v34 = vmax.f32 %v416_v31, 0.0  ;;  %vm487_vm3 = vcmp.ge.s32.totalorder %v1698_v28, 1  ;;  %vm609_vm5 = vcmp.le.s32.totalorder %v1698_v28, 14 }
  0xfb   : > { %v421_v33 = vpop.f32.mrb[4].mxu0  ;;  %v429_v46 = vmax.f32 %v418_v44, 0.0  ;;  %vm488_vm4 = vmand %vm486_vm2, %vm487_vm3  ;;  %v1720_v44 = vand.u32 127, %v477_v29  ;;  %v1737_v7 = vmul.f32 %v1527_v40, %v1533_v41 }
  0xfc   : > { %v1507_v35 = vpop.f32.mrb[5].mxu0  ;;  %v1513_v36 = vmin.f32 %v428_v34, 6.0  ;;  %v422_v51 = vadd.f32 %v421_v33, %v324_v37  ;;  %v491_v33 = vshrl.u32 %v477_v29, 7  ;;  %v489_v39 = vsel %vm488_vm4, 1, %v2204_v2  ;;  %vm610_vm6 = vmand %vm486_vm2, %vm609_vm5 }
  0xfd   : > { %v1557_v47 = vmin.f32 %v429_v46, 6.0  ;;  %v424_v0 = vadd.f32 %v1507_v35, %v324_v37  ;;  %v671_v29 = vsel %vm487_vm3, 1, %v2204_v2  ;;  %vm2219_vm8 = vcmp.lt.s32.totalorder %v1720_v44, 17  ;;  %vm792_vm9 = vmand %vm791_vm7, %vm487_vm3 }
  0xfe   : > { %652 = vrot.lane.b32.xlu0 %v1501_v30, %s1337_s21  ;;  %530 = vrot.lane.b32.xlu1 %v1501_v30, %s1338_s22  ;;  %v430_v52 = vmax.f32 %v422_v51, 0.0  ;;  %v1713_v37 = vsub.s32 0, %v491_v33  ;;  %v1715_v38 = vsub.s32 1, %v491_v33  ;;  %v459_v33 = vmul.f32 %v1527_v40, %v1501_v30 }
  0xff   : > { %v431_v4 = vmax.f32 %v424_v0, 0.0  ;;  %v1745_v13 = vmul.f32 %v1571_v50, %v1513_v36  ;;  %vm2215_vm12 = vcmp.lt.s32.totalorder %v1720_v44, 16  ;;  %vm2224_vm15 = vcmp.lt.s32.totalorder %v1720_v44, 15 }
 0x100   : > { %v1585_v55 = vmin.f32 %v430_v52, 6.0  ;;  %v549_v52 = vsel %vm486_vm2, 1, %v2204_v2  ;;  %v497_v0 = vrot.slane %v489_v39, %v1715_v38  ;;  %vm2223_vm2 = vcmp.lt.s32.totalorder %v1720_v44, 1 }
 0x101   : > { %v1638_v8 = vmin.f32 %v431_v4, 6.0  ;;  %v553_v4 = vrot.slane %v549_v52, %v1713_v37 }
 0x102   : > { %712 = vrot.lane.b32.xlu0 %v1501_v30, %s1339_s23  ;;  %467 = vrot.lane.b32.xlu1 %v1513_v36, %s1336_s20  ;;  %2238 = vst [vmem:[#allocation8_spill] sm:$0xff] %v1585_v55  ;;  %vm1764_vm11 = vcmp.eq.s32.totalorder %v497_v0, 1 }
 0x103   : > { %2241 = vst [vmem:[#allocation11_spill] sm:$0xff] %v1638_v8  ;;  %vm1772_vm13 = vcmp.eq.s32.totalorder %v553_v4, 1 }
 0x106   : > { %772 = vrot.lane.b32.xlu0 %v1501_v30, %s1340_s24  ;;  %532 = vrot.lane.b32.xlu1 %v1513_v36, %s1338_s22 }
 0x10a   : > { %834 = vrot.lane.b32.xlu0 %v1501_v30, %s1341_s25  ;;  %592 = vrot.lane.b32.xlu1 %v1513_v36, %s1335_s19 }
 0x10e   : > { %894 = vrot.lane.b32.xlu0 %v1501_v30, %s1342_s26  ;;  %654 = vrot.lane.b32.xlu1 %v1513_v36, %s1337_s21  ;;  %v2251_v30 = vmov 0  }
 0x10f   : > { %v731_v40 = vsel %vm609_vm5, 1, %v2251_v30  ;;  %v793_v53 = vsel %vm792_vm9, 1, %v2251_v30  ;;  %v853_v16 = vsel %vm791_vm7, 1, %v2251_v30 }
 0x112   : > { %471 = vrot.lane.b32.xlu0 %v1533_v41, %s1336_s20  ;;  %714 = vrot.lane.b32.xlu1 %v1513_v36, %s1339_s23 }
 0x116   : > { %536 = vrot.lane.b32.xlu0 %v1533_v41, %s1338_s22  ;;  %774 = vrot.lane.b32.xlu1 %v1513_v36, %s1340_s24 }
 0x11a   : > { %596 = vrot.lane.b32.xlu0 %v1533_v41, %s1335_s19  ;;  %836 = vrot.lane.b32.xlu1 %v1513_v36, %s1341_s25 }
 0x11e   : > { %658 = vrot.lane.b32.xlu0 %v1533_v41, %s1337_s21  ;;  %896 = vrot.lane.b32.xlu1 %v1513_v36, %s1342_s26  ;;  %v2252_v36 = vmov 0 }
 0x122   : > { %718 = vrot.lane.b32.xlu0 %v1533_v41, %s1339_s23  ;;  %473 = vrot.lane.b32.xlu1 %v1557_v47, %s1336_s20 }
 0x126   : > { %778 = vrot.lane.b32.xlu0 %v1533_v41, %s1340_s24  ;;  %538 = vrot.lane.b32.xlu1 %v1557_v47, %s1338_s22 }
 0x12a   : > { %840 = vrot.lane.b32.xlu0 %v1533_v41, %s1341_s25  ;;  %598 = vrot.lane.b32.xlu1 %v1557_v47, %s1335_s19 }
 0x12e   : > { %900 = vrot.lane.b32.xlu0 %v1533_v41, %s1342_s26  ;;  %660 = vrot.lane.b32.xlu1 %v1557_v47, %s1337_s21  ;;  %v1758_v41 = vmul.f32 %v1571_v50, %v1557_v47 }
 0x132   : > { %469 = vrot.lane.b32.xlu0 %v1585_v55, %s1336_s20  ;;  %720 = vrot.lane.b32.xlu1 %v1557_v47, %s1339_s23 }
 0x136   : > { %534 = vrot.lane.b32.xlu0 %v1585_v55, %s1338_s22  ;;  %780 = vrot.lane.b32.xlu1 %v1557_v47, %s1340_s24 }
 0x13a   : > { %594 = vrot.lane.b32.xlu0 %v1585_v55, %s1335_s19  ;;  %842 = vrot.lane.b32.xlu1 %v1557_v47, %s1341_s25 }
 0x13e   : > { %716 = vrot.lane.b32.xlu0 %v1585_v55, %s1339_s23  ;;  %902 = vrot.lane.b32.xlu1 %v1557_v47, %s1342_s26  ;;  %v679_v47 = vrot.slane %v671_v29, %v1715_v38 }
 0x140   : > { %vm1812_vm4 = vcmp.eq.s32.totalorder %v679_v47, 1 }
 0x142   : > { %838 = vrot.lane.b32.xlu0 %v1585_v55, %s1341_s25  ;;  %656 = vrot.lane.b32.xlu1 %v1585_v55, %s1337_s21 }
 0x146   : > { %776 = vrot.lane.b32.xlu1 %v1585_v55, %s1340_s24  ;;  %970 = vperm.xlu0 %1258, %v957_v63   ;;  %v493_v63 = vrot.slane %v489_v39, %v1713_v37  ;;  %v557_v39 = vrot.slane %v549_v52, %v1715_v38  ;;  %v2254_v52 = vmov 0 }
 0x147   : > { %v2255_v52 = vsel %vm1764_vm11, 4294967295, %v2254_v52 }
 0x148   : > { %vm1760_vm10 = vcmp.eq.s32.totalorder %v493_v63, 1  ;;  %vm1779_vm14 = vcmp.eq.s32.totalorder %v557_v39, 1  ;;  %v2258_v63 = vmov 0 }
 0x149   : > { %v2253_v36 = vsel %vm1760_vm10, 4294967295, %v2252_v36  ;;  %v2259_v63 = vsel %vm1779_vm14, 4294967295, %v2258_v63 }
 0x14a   : > { %898 = vrot.lane.b32.xlu1 %v1585_v55, %s1342_s26  ;;  %995 = vperm.xlu0 %1258, %v992_v3   ;;  %v611_v3 = vsel %vm610_vm6, 1, %v2204_v2  ;;  %vm913_vm6 = vmand %vm791_vm7, %vm609_vm5 }
 0x14b   : > { %v615_v2 = vrot.slane %v611_v3, %v1713_v37  ;;  %v619_v11 = vrot.slane %v611_v3, %v1715_v38  ;;  %v675_v3 = vrot.slane %v671_v29, %v1713_v37  ;;  %v2262_v29 = vmov 0 }
 0x14d   : > { %vm1788_vm0 = vcmp.eq.s32.totalorder %v615_v2, 1  ;;  %vm1792_vm1 = vcmp.eq.s32.totalorder %v619_v11, 1  ;;  %vm1803_vm3 = vcmp.eq.s32.totalorder %v675_v3, 1 }
 0x14e   : > { %475 = vrot.lane.b32.xlu1 %v1638_v8, %s1336_s20  ;;  %v2263_v29 = vsel %vm1792_vm1, 4294967295, %v2262_v29  ;;  %s2149_s20 = scalar_lea.hbm %s2199_s8, %s1175_s12 }
 0x152   : > { %540 = vrot.lane.b32.xlu1 %v1638_v8, %s1338_s22  ;;  %s1265_s22 = sshll.u32 %s1343_s9, 4  ;;  %s1266_s22 = int_to_ptr.vmem [resolvable:$false] %s1265_s22 }
 0x156   : > { %600 = vrot.lane.b32.xlu1 %v1638_v8, %s1335_s19 }
 0x15a   : > { %662 = vrot.lane.b32.xlu1 %v1638_v8, %s1337_s21 }
 0x15e   : > { %722 = vrot.lane.b32.xlu1 %v1638_v8, %s1339_s23  ;;  %s1267_s23 = scalar_lea.vmem %s1266_s22, 256 }
 0x162   : > { %782 = vrot.lane.b32.xlu1 %v1638_v8, %s1340_s24 }
 0x166   : > { %844 = vrot.lane.b32.xlu1 %v1638_v8, %s1341_s25  ;;  %s296_s25 = sand.u32 1, %s1315_s28  }
 0x167   : > { %s1082_s21 = scalar_lea.sflag [#allocation3], %s296_s25 }
 0x16a   : > { %904 = vrot.lane.b32.xlu1 %v1638_v8, %s1342_s26  ;;  %v735_v8 = vrot.slane %v731_v40, %v1713_v37  ;;  %s1159_s26 = sshll.u32 %s296_s25, 3 }
 0x16b   : > { %s298_s13 = scalar_lea.vmem [#allocation2], %s1159_s26 }
 0x16c   : > { %v1676_v19 = vpop.permute.xlu0 %590  ;;  %v466_v20 = vpop.permute.xlu1 %465  ;;  %vm1823_vm9 = vcmp.eq.s32.totalorder %v735_v8, 1  ;;  %s1096_s17 = sshll.u32 %s298_s13, 4  ;;  %s2151_s17 = int_to_ptr.vmem [resolvable:$true] %s1096_s17 }
 0x16d   : > { %p1268_p0 = scmp.lt.s32.totalorder %s2151_s17, %s1266_s22 }
 0x170   : > { %v1678_v21 = vpop.permute.xlu0 %652  ;;  %v1680_v22 = vpop.permute.xlu1 %530 }
 0x174   : > { %v1682_v23 = vpop.permute.xlu0 %712  ;;  %v1684_v24 = vpop.permute.xlu1 %467 }
 0x178   : > { %v1686_v25 = vpop.permute.xlu0 %772  ;;  %v1688_v26 = vpop.permute.xlu1 %532 }
 0x17c   : > { %v1700_v31 = vpop.permute.xlu0 %834  ;;  %v1702_v32 = vpop.permute.xlu1 %592 }
 0x180   : > { %v1706_v34 = vpop.permute.xlu0 %894  ;;  %v1708_v35 = vpop.permute.xlu1 %654 }
 0x184   : > { %v472_v46 = vpop.permute.xlu0 %471  ;;  %v1722_v51 = vpop.permute.xlu1 %714 }
 0x185   : > { %v483_v9 = vsel %vm2219_vm8, %v472_v46, %v466_v20  ;;  %v480_v50 = vsel %vm2219_vm8, %v466_v20, %v472_v46  ;;  %v739_v20 = vrot.slane %v731_v40, %v1715_v38 }
 0x186   : > { %v500_v46 = vsel %vm1760_vm10, %v483_v9, 0.0  ;;  %v501_v11 = vsel %vm1764_vm11, %v480_v50, 0.0  ;;  %v797_v9 = vrot.slane %v793_v53, %v1713_v37  ;;  %v2338_v50 = vld [vmem:[#allocation14_spill] sm:$0xff] }
 0x187   : > { %v519_v8 = vmul.f32 %v1535_v42, %v501_v11  ;;  %v857_v11 = vrot.slane %v853_v16, %v1713_v37 }
 0x188   : > { %v537_v17 = vpop.permute.xlu0 %536  ;;  %v1741_v15 = vpop.permute.xlu1 %774 }
 0x189   : > { %v546_v39 = vsel %vm2215_vm12, %v537_v17, %v1680_v22  ;;  %v543_v40 = vsel %vm2215_vm12, %v1680_v22, %v537_v17  ;;  %v801_v17 = vrot.slane %v793_v53, %v1715_v38  ;;  %v518_v22 = vmul.f32 %v1535_v42, %v500_v46 }
 0x18a   : > { %v560_v47 = vsel %vm1772_vm13, %v546_v39, 0.0  ;;  %vm1831_vm12 = vcmp.eq.s32.totalorder %v739_v20, 1  ;;  %v2275_v39 = vmov 0  ;;  %vm1892_vm8 = vcmp.eq.s32.totalorder %v857_v11, 1 }
 0x18b   : > { %v578_v28 = vmul.f32 %v1587_v56, %v560_v47  ;;  %vm1862_vm5 = vcmp.eq.s32.totalorder %v801_v17, 1 }
 0x18c   : > { %v597_v0 = vpop.permute.xlu0 %596  ;;  %v1783_v58 = vpop.permute.xlu1 %836  ;;  %v2276_v39 = vsel %vm1862_vm5, 4294967295, %v2275_v39 }
 0x18d   : > { %v606_v3 = vsel %vm2224_vm15, %v597_v0, %v1676_v19  ;;  %v603_v53 = vsel %vm2224_vm15, %v1676_v19, %v597_v0 }
 0x18e   : > { %v622_v20 = vsel %vm1788_vm0, %v606_v3, 0.0  ;;  %v524_v3 = vadd.f32 %v518_v22, %v459_v33 }
 0x18f   : > { %v640_v17 = vmul.f32 %v1559_v48, %v622_v20 }
 0x190   : > { %v659_v49 = vpop.permute.xlu0 %658  ;;  %v1820_v18 = vpop.permute.xlu1 %896 }
 0x191   : > { %2268 = vst [vmem:[#allocation21_spill] sm:$0xff] %v1820_v18  ;;  %v561_v18 = vsel %vm1779_vm14, %v543_v40, 0.0  ;;  %v665_v42 = vsel %vm2223_vm2, %v1678_v21, %v659_v49  ;;  %v668_v46 = vsel %vm2223_vm2, %v659_v49, %v1678_v21  ;;  %vm1857_vm14 = vcmp.eq.s32.totalorder %v797_v9, 1 }
 0x192   : > { %v861_v40 = vrot.slane %v853_v16, %v1715_v38  ;;  %v579_v10 = vmul.f32 %v1587_v56, %v561_v18  ;;  %v623_v49 = vsel %vm1792_vm1, %v603_v53, 0.0  ;;  %v914_v21 = vsel %vm913_vm6, 1, %v2251_v30 }
 0x193   : > { %v525_v9 = vadd.f32 %v519_v8, %v1737_v7  ;;  %v682_v47 = vsel %vm1803_vm3, %v668_v46, 0.0  ;;  %v683_v16 = vsel %vm1812_vm4, %v665_v42, 0.0  ;;  %vm2277_vm2 = vcmp.lt.s32.totalorder %v1720_v44, 127 }
 0x194   : > { %v719_v0 = vpop.permute.xlu0 %718  ;;  %v474_v27 = vpop.permute.xlu1 %473  ;;  %vm2278_vm15 = vmmov %vm2277_vm2  ;;  %vm2279_vm6 = vcmp.lt.s32.totalorder %v1720_v44, 17  ;;  %v584_v30 = vadd.f32 %v578_v28, %v524_v3  ;;  %v641_v22 = vmul.f32 %v1559_v48, %v623_v49  ;;  %v2283_v42 = vmov 0 }
 0x195   : > { %v725_v56 = vsel %vm2277_vm2, %v1682_v23, %v719_v0  ;;  %v728_v18 = vsel %vm2278_vm15, %v719_v0, %v1682_v23  ;;  %v481_v7 = vsel %vm2279_vm6, %v1684_v24, %v474_v27  ;;  %vm2280_vm7 = vmmov %vm2279_vm6  ;;  %vm1896_vm2 = vcmp.eq.s32.totalorder %v861_v40, 1 }
 0x196   : > { %v484_v33 = vsel %vm2280_vm7, %v474_v27, %v1684_v24  ;;  %v2284_v42 = vsel %vm1896_vm2, 4294967295, %v2283_v42  ;;  %v918_v23 = vrot.slane %v914_v21, %v1713_v37  ;;  %v585_v46 = vadd.f32 %v579_v10, %v525_v9 }
 0x197   : > { %v700_v0 = vmul.f32 %v1579_v54, %v682_v47  ;;  %v701_v24 = vmul.f32 %v1579_v54, %v683_v16  ;;  %vm2285_vm15 = vcmp.lt.s32.totalorder %v1720_v44, 113  ;;  %v742_v28 = vsel %vm1823_vm9, %v725_v56, 0.0 }
 0x198   : > { %v779_v8 = vpop.permute.xlu0 %778  ;;  %v539_v53 = vpop.permute.xlu1 %538  ;;  %v743_v27 = vsel %vm1831_vm12, %v728_v18, 0.0  ;;  %v502_v11 = vsel %vm1760_vm10, %v484_v33, 0.0  ;;  %v503_v10 = vsel %vm1764_vm11, %v481_v7, 0.0  ;;  %v646_v37 = vadd.f32 %v640_v17, %v584_v30  ;;  %vm2286_vm7 = vmmov %vm2285_vm15 }
 0x199   : > { %v785_v48 = vsel %vm2285_vm15, %v1686_v25, %v779_v8  ;;  %v788_v54 = vsel %vm2286_vm7, %v779_v8, %v1686_v25  ;;  %v922_v40 = vrot.slane %v914_v21, %v1715_v38  ;;  %v647_v3 = vadd.f32 %v641_v22, %v585_v46 }
 0x19a   : > { %v804_v49 = vsel %vm1857_vm14, %v785_v48, 0.0  ;;  %vm2287_vm15 = vcmp.lt.s32.totalorder %v1720_v44, 16  ;;  %vm1927_vm10 = vcmp.eq.s32.totalorder %v918_v23, 1  ;;  %v2289_v25 = vmov 0 }
 0x19b   : > { %v544_v9 = vsel %vm2287_vm15, %v1688_v26, %v539_v53  ;;  %vm2288_vm11 = vmmov %vm2287_vm15  ;;  %v2290_v25 = vsel %vm1927_vm10, 4294967295, %v2289_v25  ;;  %v760_v38 = vmul.f32 %v1593_v57, %v742_v28  ;;  %v761_v21 = vmul.f32 %v1593_v57, %v743_v27 }
 0x19c   : > { %v547_v17 = vsel %vm2288_vm11, %v539_v53, %v1688_v26  ;;  %v841_v47 = vpop.permute.xlu0 %840  ;;  %v599_v16 = vpop.permute.xlu1 %598  ;;  %v520_v56 = vmul.f32 %v1545_v43, %v502_v11  ;;  %v521_v18 = vmul.f32 %v1545_v43, %v503_v10  ;;  %v706_v7 = vadd.f32 %v700_v0, %v646_v37 }
 0x19d   : > { %v707_v33 = vadd.f32 %v701_v24, %v647_v3  ;;  %v805_v30 = vsel %vm1862_vm5, %v788_v54, 0.0  ;;  %vm2291_vm11 = vcmp.lt.s32.totalorder %v1720_v44, 15  ;;  %v822_v22 = vmul.f32 %v1613_v61, %v804_v49 }
 0x19e   : > { %v607_v26 = vsel %vm2291_vm11, %v599_v16, %v1702_v32  ;;  %v562_v8 = vsel %vm1772_vm13, %v547_v17, 0.0  ;;  %vm2292_vm7 = vnez %v2259_v63  ;;  %vm2293_vm15 = vmmov %vm2291_vm11  ;;  %vm2294_vm6 = vcmp.lt.s32.totalorder %v1720_v44, 112 }
 0x19f   : > { %v563_v57 = vsel %vm2292_vm7, %v544_v9, 0.0  ;;  %v604_v43 = vsel %vm2293_vm15, %v1702_v32, %v599_v16  ;;  %v847_v53 = vsel %vm2294_vm6, %v1700_v31, %v841_v47  ;;  %vm2295_vm5 = vmmov %vm2294_vm6  ;;  %v624_v46 = vsel %vm1788_vm0, %v607_v26, 0.0 }
 0x1a0   : > { %v850_v23 = vsel %vm2295_vm5, %v841_v47, %v1700_v31  ;;  %vm1956_vm11 = vcmp.eq.s32.totalorder %v922_v40, 1  ;;  %v2296_v0 = vmov 0  ;;  %v661_v24 = vpop.permute.xlu1 %660  ;;  %v766_v48 = vadd.f32 %v760_v38, %v706_v7  ;;  %v901_v11 = vpop.permute.xlu0 %900 }
 0x1a1   : > { %v2297_v0 = vsel %vm1956_vm11, 4294967295, %v2296_v0  ;;  %v767_v28 = vadd.f32 %v761_v21, %v707_v33  ;;  %v526_v32 = vadd.f32 %v520_v56, %v1745_v13  ;;  %v527_v27 = vadd.f32 %v521_v18, %v1758_v41 }
 0x1a2   : > { %v823_v10 = vmul.f32 %v1613_v61, %v805_v30  ;;  %v580_v37 = vmul.f32 %v1551_v45, %v562_v8  ;;  %v581_v31 = vmul.f32 %v1551_v45, %v563_v57  ;;  %v625_v54 = vsel %vm1792_vm1, %v604_v43, 0.0 }
 0x1a3   : > { %v828_v40 = vadd.f32 %v822_v22, %v766_v48  ;;  %v864_v3 = vsel %vm1892_vm8, %v847_v53, 0.0  ;;  %v865_v49 = vsel %vm1896_vm2, %v850_v23, 0.0  ;;  %v642_v13 = vmul.f32 %v1607_v60, %v624_v46 }
 0x1a4   : > { %vm2298_vm5 = vcmp.lt.s32.totalorder %v1720_v44, 111  ;;  %vm2300_vm15 = vcmp.lt.s32.totalorder %v1720_v44, 1  ;;  %v721_v17 = vpop.permute.xlu1 %720  ;;  %v643_v47 = vmul.f32 %v1607_v60, %v625_v54  ;;  %v829_v21 = vadd.f32 %v823_v10, %v767_v28 }
 0x1a5   : > { %v907_v61 = vsel %vm2298_vm5, %v1706_v34, %v901_v11  ;;  %vm2299_vm6 = vmmov %vm2298_vm5  ;;  %v666_v41 = vsel %vm2300_vm15, %v1708_v35, %v661_v24  ;;  %vm2302_vm5 = vcmp.lt.s32.totalorder %v1720_v44, 127  ;;  %v586_v56 = vadd.f32 %v580_v37, %v526_v32 }
 0x1a6   : > { %v910_v45 = vsel %vm2299_vm6, %v901_v11, %v1706_v34  ;;  %vm2301_vm1 = vmmov %vm2300_vm15  ;;  %v685_v38 = vsel %vm1812_vm4, %v666_v41, 0.0  ;;  %v726_v34 = vsel %vm2302_vm5, %v1722_v51, %v721_v17  ;;  %v587_v18 = vadd.f32 %v581_v31, %v527_v27  ;;  %v2309_v41 = vld [vmem:[#allocation13_spill] sm:$0xff] }
 0x1a7   : > { %v669_v9 = vsel %vm2301_vm1, %v661_v24, %v1708_v35  ;;  %vm2303_vm6 = vmmov %vm2302_vm5  ;;  %v882_v7 = vmul.f32 %v1636_v6, %v864_v3  ;;  %v883_v60 = vmul.f32 %v1636_v6, %v865_v49  ;;  %v925_v33 = vsel %vm1927_vm10, %v907_v61, 0.0 }
 0x1a8   : > { %v684_v16 = vsel %vm1803_vm3, %v669_v9, 0.0  ;;  %v729_v35 = vsel %vm2303_vm6, %v721_v17, %v1722_v51  ;;  %v926_v30 = vsel %vm1956_vm11, %v910_v45, 0.0  ;;  %v703_v22 = vmul.f32 %v1632_v5, %v685_v38  ;;  %v781_v57 = vpop.permute.xlu1 %780  ;;  %v2310_v38 = vld [vmem:[#allocation21_spill] sm:$0xff] }
 0x1a9   : > { %v702_v26 = vmul.f32 %v1632_v5, %v684_v16  ;;  %v744_v8 = vsel %vm1823_vm9, %v726_v34, 0.0  ;;  %v745_v51 = vsel %vm1831_vm12, %v729_v35, 0.0  ;;  %v648_v43 = vadd.f32 %v642_v13, %v586_v56 }
 0x1aa   : > { %v649_v53 = vadd.f32 %v643_v47, %v587_v18  ;;  %vm2304_vm1 = vcmp.lt.s32.totalorder %v1720_v44, 113  ;;  %v943_v46 = vmul.f32 %v1652_v12, %v925_v33  ;;  %v944_v5 = vmul.f32 %v1652_v12, %v926_v30  ;;  %v2313_v18 = vld [vmem:[#allocation18_spill] sm:$0xff]  ;;  %v2314_v30 = vld [vmem:[#allocation16_spill] sm:$0xff] }
 0x1ab   : > { %v786_v6 = vsel %vm2304_vm1, %v1741_v15, %v781_v57  ;;  %vm2305_vm15 = vmmov %vm2304_vm1  ;;  %vm2306_vm5 = vnez %v2276_v39  ;;  %v762_v28 = vmul.f32 %v1601_v59, %v744_v8  ;;  %v763_v32 = vmul.f32 %v1601_v59, %v745_v51 }
 0x1ac   : > { %v789_v23 = vsel %vm2305_vm15, %v781_v57, %v1741_v15  ;;  %v806_v24 = vsel %vm1857_vm14, %v786_v6, 0.0  ;;  %v888_v27 = vadd.f32 %v882_v7, %v828_v40  ;;  %v889_v11 = vadd.f32 %v883_v60, %v829_v21  ;;  %v843_v31 = vpop.permute.xlu1 %842 }
 0x1ad   : > { %v807_v48 = vsel %vm2306_vm5, %v789_v23, 0.0  ;;  %v708_v10 = vadd.f32 %v702_v26, %v648_v43  ;;  %v709_v37 = vadd.f32 %v703_v22, %v649_v53  ;;  %v824_v15 = vmul.f32 %v1625_v1, %v806_v24  ;;  %v2315_v43 = vld [vmem:[#allocation20_spill] sm:$0xff] }
 0x1ae   : > { %v825_v54 = vmul.f32 %v1625_v1, %v807_v48  ;;  %vm2307_vm6 = vcmp.lt.s32.totalorder %v1720_v44, 112  ;;  %v949_v49 = vadd.f32 %v943_v46, %v888_v27  ;;  %v950_v13 = vadd.f32 %v944_v5, %v889_v11 }
 0x1af   : > { %v848_v12 = vsel %vm2307_vm6, %v1783_v58, %v843_v31  ;;  %vm2308_vm1 = vmmov %vm2307_vm6  ;;  %v768_v61 = vadd.f32 %v762_v28, %v708_v10  ;;  %v769_v45 = vadd.f32 %v763_v32, %v709_v37  ;;  %vm2311_vm15 = vcmp.lt.s32.totalorder %v1720_v44, 111 }
 0x1b0   : > { %v851_v3 = vsel %vm2308_vm1, %v843_v31, %v1783_v58  ;;  %v866_v59 = vsel %vm1892_vm8, %v848_v12, 0.0  ;;  %v903_v17 = vpop.permute.xlu1 %902  ;;  %vm2312_vm6 = vmmov %vm2311_vm15  ;;  %v974_v35 = vadd.f32 %v2313_v18, %v950_v13  ;;  %v973_v7 = vadd.f32 %v2313_v18, %v949_v49  ;;  %v2327_v18 = vld [vmem:[#allocation11_spill] sm:$0xff] }
 0x1b1   : > { %v867_v40 = vsel %vm1896_vm2, %v851_v3, 0.0  ;;  %v884_v1 = vmul.f32 %v2309_v41, %v866_v59  ;;  %v830_v47 = vadd.f32 %v824_v15, %v768_v61  ;;  %v831_v16 = vadd.f32 %v825_v54, %v769_v45  ;;  %v470_v15 = vpop.permute.xlu0 %469 }
 0x1b2   : > { %v885_v9 = vmul.f32 %v2309_v41, %v867_v40  ;;  %v908_v58 = vsel %vm2311_vm15, %v2310_v38, %v903_v17  ;;  %v911_v34 = vsel %vm2312_vm6, %v903_v17, %v2310_v38  ;;  %v980_v6 = vmax.f32 %v974_v35, 0.0 }
 0x1b3   : > { %v927_v21 = vsel %vm1927_vm10, %v908_v58, 0.0  ;;  %v928_v56 = vsel %vm1956_vm11, %v911_v34, 0.0  ;;  %v890_v60 = vadd.f32 %v884_v1, %v830_v47  ;;  %v979_v46 = vmax.f32 %v973_v7, 0.0  ;;  %v2325_v34 = vld [vmem:[#allocation8_spill] sm:$0xff]  ;;  %v2330_v7 = vld [vmem:[#allocation9_spill] sm:$0xff] }
 0x1b4   : > { %v891_v33 = vadd.f32 %v885_v9, %v831_v16  ;;  %v945_v26 = vmul.f32 %v2314_v30, %v927_v21  ;;  %v946_v22 = vmul.f32 %v2314_v30, %v928_v56  ;;  %v657_v8 = vpop.permute.xlu1 %656  ;;  %v986_v28 = vmin.f32 %v980_v6, 6.0  ;;  %v2322_v9 = vld [vmem:[#allocation6_spill] sm:$0xff]  ;;  %v2326_v21 = vld [vmem:[#allocation7_spill] sm:$0xff] }
 0x1b5   : > { %v985_v27 = vmin.f32 %v979_v46, 6.0  ;;  %v535_v12 = vpop.permute.xlu0 %534  ;;  %vm2316_vm1 = vcmp.lt.s32.totalorder %v1720_v44, 17  ;;  %vm2318_vm6 = vnez %v2253_v36  ;;  %vm2319_vm11 = vnez %v2255_v52 }
 0x1b6   : > { %v951_v51 = vadd.f32 %v945_v26, %v890_v60  ;;  %v952_v57 = vadd.f32 %v946_v22, %v891_v33  ;;  %vm2317_vm15 = vmmov %vm2316_vm1  ;;  %vm2320_vm10 = vcmp.lt.s32.totalorder %v1720_v44, 16  ;;  %v463_v56 = vmul.f32 %v2326_v21, %v2325_v34 }
 0x1b7   : > { %vm2321_vm2 = vmmov %vm2320_vm10  ;;  %v464_v35 = vmul.f32 %v2326_v21, %v2327_v18  ;;  %v2348_v18 = vld [vmem:[#allocation19_spill] sm:$0xff] }
 0x1b8   : > { %v976_v53 = vadd.f32 %v2315_v43, %v952_v57  ;;  %v975_v23 = vadd.f32 %v2315_v43, %v951_v51  ;;  %v777_v5 = vpop.permute.xlu1 %776 }
 0x1b9   : > { %v595_v1 = vpop.permute.xlu0 %594 }
 0x1ba   : > { %v982_v24 = vmax.f32 %v976_v53, 0.0  ;;  %v981_v48 = vmax.f32 %v975_v23, 0.0  ;;  %v2334_v23 = vld [vmem:[#allocation10_spill] sm:$0xff] }
 0x1bc   : > { %v988_v32 = vmin.f32 %v982_v24, 6.0  ;;  %v987_v11 = vmin.f32 %v981_v48, 6.0  ;;  %v2051_v10 = vpop.permute.xlu1 %898 }
 0x1bd   : > { %v717_v22 = vpop.permute.xlu0 %716 }
 0x1be   : > { %v1176_v37 = vpack.c.bf16 %v988_v32, %v986_v28  ;;  %v1178_v31 = vpack.c.bf16 %v987_v11, %v985_v27  ;;  %v2335_v28 = vld [vmem:[#allocation12_spill] sm:$0xff] }
 0x1c0   : > { %1177 = vmatprep.subr.bf16.mxu1 %v1176_v37  ;;  %v476_v54 = vpop.permute.xlu1 %475 }
 0x1c1   : > { %1179 = vmatpush1.bf16.msra.mxu1 %v1178_v31  ;;  %v482_v49 = vsel %vm2316_vm1, %v470_v15, %v476_v54  ;;  %v485_v59 = vsel %vm2317_vm15, %v476_v54, %v470_v15 }
 0x1c2   : > { %v504_v40 = vsel %vm2318_vm6, %v485_v59, 0.0  ;;  %v505_v13 = vsel %vm2319_vm11, %v482_v49, 0.0  ;;  %vm2323_vm11 = vcmp.lt.s32.totalorder %v1720_v44, 15  ;;  %v839_v59 = vpop.permute.xlu0 %838  ;;  %vm2347_vm6 = vnez %v2297_v0  ;;  %v991_v0 = vld [vmem:[%s2197_s6] sm:$0xf] }
 0x1c3   : > { %v522_v17 = vmul.f32 %v2322_v9, %v504_v40  ;;  %v523_v47 = vmul.f32 %v2322_v9, %v505_v13  ;;  %vm2324_vm1 = vmmov %vm2323_vm11 }
 0x1c4   : > { %v541_v3 = vpop.permute.xlu1 %540 }
 0x1c5   : > { %v545_v45 = vsel %vm2320_vm10, %v535_v12, %v541_v3  ;;  %v548_v41 = vsel %vm2321_vm2, %v541_v3, %v535_v12  ;;  %vm2328_vm10 = vcmp.lt.s32.totalorder %v1720_v44, 1  ;;  %vm2331_vm2 = vnez %v2263_v29 }
 0x1c6   : > { %v564_v16 = vsel %vm1772_vm13, %v548_v41, 0.0  ;;  %v565_v36 = vsel %vm2292_vm7, %v545_v45, 0.0  ;;  %vm2329_vm13 = vmmov %vm2328_vm10  ;;  %v528_v51 = vadd.f32 %v522_v17, %v463_v56  ;;  %v529_v57 = vadd.f32 %v523_v47, %v464_v35  ;;  %v2339_v45 = vld [vmem:[#allocation15_spill] sm:$0xff] }
 0x1c7   : > { %v582_v60 = vmul.f32 %v2330_v7, %v564_v16  ;;  %v583_v33 = vmul.f32 %v2330_v7, %v565_v36  ;;  %vm2332_vm7 = vcmp.lt.s32.totalorder %v1720_v44, 127  ;;  %v2343_v16 = vld [vmem:[#allocation17_spill] sm:$0xff] }
 0x1c8   : > { %v601_v61 = vpop.permute.xlu1 %600  ;;  %vm2333_vm15 = vmmov %vm2332_vm7 }
 0x1c9   : > { %v605_v52 = vsel %vm2323_vm11, %v595_v1, %v601_v61  ;;  %v608_v38 = vsel %vm2324_vm1, %v601_v61, %v595_v1  ;;  %v588_v24 = vadd.f32 %v582_v60, %v528_v51  ;;  %v589_v48 = vadd.f32 %v583_v33, %v529_v57 }
 0x1ca   : > { %v626_v30 = vsel %vm1788_vm0, %v608_v38, 0.0  ;;  %v627_v26 = vsel %vm2331_vm2, %v605_v52, 0.0  ;;  %vm2336_vm0 = vcmp.lt.s32.totalorder %v1720_v44, 113  ;;  %vm998_vm11 = vcmask 195584  }
 0x1cb   : > { %v644_v46 = vmul.f32 %v2334_v23, %v626_v30  ;;  %v645_v29 = vmul.f32 %v2334_v23, %v627_v26  ;;  %v971_v30 = vpop.permute.xlu0 %970 }
 0x1cc   : > { %v663_v58 = vpop.permute.xlu1 %662 }
 0x1cd   : > { %v667_v62 = vsel %vm2328_vm10, %v657_v8, %v663_v58  ;;  %v670_v63 = vsel %vm2329_vm13, %v663_v58, %v657_v8  ;;  %v650_v15 = vadd.f32 %v644_v46, %v588_v24  ;;  %v651_v54 = vadd.f32 %v645_v29, %v589_v48  ;;  %v2349_v46 = vld [vmem:[#allocation5_spill] sm:$0xff] }
 0x1ce   : > { %v686_v53 = vsel %vm1803_vm3, %v670_v63, 0.0  ;;  %v687_v8 = vsel %vm1812_vm4, %v667_v62, 0.0  ;;  %vm2337_vm3 = vmmov %vm2336_vm0  ;;  %vm2342_vm4 = vnez %v2284_v42 }
 0x1cf   : > { %v704_v32 = vmul.f32 %v2335_v28, %v686_v53  ;;  %v705_v2 = vmul.f32 %v2335_v28, %v687_v8  ;;  %v996_v57 = vpop.permute.xlu0 %995 }
 0x1d0   : > { %v723_v43 = vpop.permute.xlu1 %722 }
 0x1d1   : > { %v727_v6 = vsel %vm2332_vm7, %v717_v22, %v723_v43  ;;  %v730_v4 = vsel %vm2333_vm15, %v723_v43, %v717_v22  ;;  %v710_v40 = vadd.f32 %v704_v32, %v650_v15  ;;  %v711_v13 = vadd.f32 %v705_v2, %v651_v54 }
 0x1d2   : > { %v746_v55 = vsel %vm1823_vm9, %v727_v6, 0.0  ;;  %v747_v27 = vsel %vm1831_vm12, %v730_v4, 0.0  ;;  %vm2340_vm12 = vcmp.lt.s32.totalorder %v1720_v44, 112  ;;  %vm2344_vm9 = vcmp.lt.s32.totalorder %v1720_v44, 111  ;;  %v1260_v4 = vld [vmem:[%s1453_s10] sm:$0xff]  ;;  %s1261_s10 = scalar_lea.vmem %s2151_s17, 128 }
 0x1d3   : > { %v764_v49 = vmul.f32 %v2338_v50, %v746_v55  ;;  %v765_v14 = vmul.f32 %v2338_v50, %v747_v27  ;;  %p1262_p11 = scmp.ne.s32.totalorder %s2151_s17, %s1261_s10  ;;  %p1269_p1 = scmp.lt.s32.totalorder %s1267_s23, %s1261_s10 }
 0x1d4   : > { %v783_v11 = vpop.permute.xlu1 %782 }
 0x1d5   : > { %v787_v37 = vsel %vm2336_vm0, %v777_v5, %v783_v11  ;;  %v790_v31 = vsel %vm2337_vm3, %v783_v11, %v777_v5  ;;  %v770_v17 = vadd.f32 %v764_v49, %v710_v40  ;;  %v771_v47 = vadd.f32 %v765_v14, %v711_v13  ;;  %p1263_p12 = pnand %p1262_p11, %p1427_p5  ;;  %p1270_p2 = por %p1269_p1, %p1268_p0 }
 0x1d6   : > { %v808_v12 = vsel %vm1857_vm14, %v787_v37, 0.0  ;;  %v809_v3 = vsel %vm2306_vm5, %v790_v31, 0.0  ;;  %vm2341_vm14 = vmmov %vm2340_vm12 }
 0x1d7   : > { %v826_v41 = vmul.f32 %v2339_v45, %v808_v12  ;;  %v827_v5 = vmul.f32 %v2339_v45, %v809_v3  ;;  %vm2345_vm5 = vmmov %vm2344_vm9  ;;  %p1264_p13 = pneg %p1263_p12 }
 0x1d8   : > { %v845_v61 = vpop.permute.xlu1 %844 }
 0x1d9   : > { %v849_v1 = vsel %vm2340_vm12, %v839_v59, %v845_v61  ;;  %v852_v19 = vsel %vm2341_vm14, %v845_v61, %v839_v59  ;;  %v832_v58 = vadd.f32 %v826_v41, %v770_v17  ;;  %v833_v34 = vadd.f32 %v827_v5, %v771_v47  ;;  %p1271_p3 = pnand %p1270_p2, %p1264_p13 }
 0x1da   : > { %v868_v39 = vsel %vm1892_vm8, %v849_v1, 0.0  ;;  %v869_v9 = vsel %vm2342_vm4, %v852_v19, 0.0  ;;  %vm2346_vm8 = vnez %v2290_v25 }
 0x1db   : > { %v886_v36 = vmul.f32 %v2343_v16, %v868_v39  ;;  %v887_v52 = vmul.f32 %v2343_v16, %v869_v9 }
 0x1dc   : > { %v905_v38 = vpop.permute.xlu1 %904 }
 0x1dd   : > { %v909_v21 = vsel %vm2344_vm9, %v2051_v10, %v905_v38  ;;  %v912_v20 = vsel %vm2345_vm5, %v905_v38, %v2051_v10  ;;  %v892_v63 = vadd.f32 %v886_v36, %v832_v58  ;;  %v893_v7 = vadd.f32 %v887_v52, %v833_v34 }
 0x1de   : > { %v929_v42 = vsel %vm2346_vm8, %v909_v21, 0.0  ;;  %v930_v56 = vsel %vm2347_vm6, %v912_v20, 0.0 }
 0x1df   : > { %v947_v35 = vmul.f32 %v2348_v18, %v929_v42  ;;  %v948_v62 = vmul.f32 %v2348_v18, %v930_v56 }
 0x1e1   : > { %v953_v60 = vadd.f32 %v947_v35, %v892_v63  ;;  %v954_v33 = vadd.f32 %v948_v62, %v893_v7 }
 0x1e3   : > { %v977_v26 = vadd.f32 %v971_v30, %v953_v60  ;;  %v978_v22 = vadd.f32 %v971_v30, %v954_v33 }
 0x1e5   : > { %v983_v44 = vmax.f32 %v977_v26, 0.0  ;;  %v984_v10 = vmax.f32 %v978_v22, 0.0 }
 0x1e7   : > { %v989_v25 = vmin.f32 %v983_v44, 6.0  ;;  %v990_v51 = vmin.f32 %v984_v10, 6.0 }
 0x1e9   : > { %1006 = vmatprep.subr.mxu1 %v990_v51 }
 0x1ea   : > { %1007 = vmatpush1.msra.mxu1 %v989_v25 }
 0x1eb   : > { %1168 = vmatmul.mubr.msk.f32.vlgmr.msra.gmra.mrb[0].mxu1 %vm998_vm11, %v991_v0 }
 0x2be   : > { %v1068_v43 = vpop.f32.mrb[0].mxu1 }
 0x2bf   : > { %v1069_v53 = vadd.f32 %v1068_v43, %v996_v57  ;;  %v1070_v8 = vpop.f32.mrb[1].mxu1 }
 0x2c0   : > { %v1071_v6 = vadd.f32 %v1070_v8, %v996_v57 }
 0x2c1   : > { %v1074_v23 = vadd.f32 %v1260_v4, %v1069_v53 }
 0x2c2   : > { %v1075_v29 = vadd.f32 %v1071_v6, %v2349_v46 }
 0x2c4   : > { %v1078_v24 = vcombine.low %v1074_v23, %v1075_v29 }
 0x2c6   : > { %1080 = vst [vmem:[%s298_s13] sm:$0xff] %v1078_v24 }
 0x2c7   : > { %1274 = shalt.err (!%p1271_p3)
}
 0x2c8   : > { %s1275_s24 = scalar_lea.hbm %s2149_s20, 128  ;;  %s1279_s12 = scalar_lea.hbm %s2199_s8, 256 }
 0x2c9   : > { %p1276_p4 = scmp.ne.s32.totalorder %s2149_s20, %s1275_s24  ;;  %p1280_p9 = scmp.lt.u32.totalorder %s2149_s20, %s2199_s8 }
 0x2ca   : > { %p1281_p10 = scmp.lt.u32.totalorder %s1279_s12, %s1275_s24  ;;  %p1283_p12 = scmp.lt.u32.totalorder %s1275_s24, %s2149_s20 }
 0x2cb   : > { %p1277_p7 = pnand %p1276_p4, %p1427_p5 }
 0x2cc   : > { %p1282_p11 = por %p1281_p10, %p1280_p9 }
 0x2cd   : > { %p1278_p8 = pneg %p1277_p7 }
 0x2ce   : > { %p1284_p13 = por %p1283_p12, %p1282_p11 }
 0x2d0   : > { %p1285_p0 = pnand %p1284_p13, %p1278_p8 }
 0x2d2   : > { %1288 = shalt.err (!%p1285_p0)
}
 0x2d3   : > { %1180 = dma.vmem_to_hbm [thread:$0]  (%p1427_p5), %s2151_s17, 128, %s2149_s20, %s1082_s21  }
 0x2d4 PF: > { %p1186_p1 = scmp.ge.s32.totalorder %s1323_s30, 2  ;;  %s1108_s19 = sand.u32 1, %s1311_s27  }
 0x2d5   : > { %s1109_s10 = scalar_lea.sflag [#allocation3], %s1108_s19 }
 0x2d6   : > { %p1183_p2 = pnand %p1186_p1, %p1431_p6 }
 0x2d8   : > { %1306 = dma.done.wait (!%p1183_p2), %s1109_s10, 128  }
 0x2d9   : > { %1308 = vsyncadd (!%p1183_p2), %s1109_s10, 4294967168  ;;  %p18_p3 = scmp.ge.s32.totalorder %s1414_s11, 4   ;;  %s2350_s27 = smov %s1315_s28 }
 0x2da   : > { %s2351_s28 = smov %s1319_s29  ;;  %s2352_s29 = smov %s1425_s14 }
 0x2db   : > { %s2353_s30 = smov %s1414_s11  ;;  %20 = sbr.rel (!%p18_p3) target bundleno = 3 (0x3), region = 88 }
 0x2e2   :  { %1114 = vsyncpa [#allocation3], 1 }
 0x2e3   :  { %1116 = vsyncpa [#allocation3 + $0x1], 1 }

</bundles_post_ra>
